<compile_context>
chip_gen: v6e
topology: v6e:2x2x1
jax: 0.10.0
libtpu: 0.0.40
codegen_flags: <defaults>
</compile_context>

<pallas_src>
import functools

import jax
import jax.numpy as jnp
from jax import lax
from jax.experimental import pallas as pl
from jax.experimental.pallas import tpu as pltpu


def _mha_kernel(q_ref, k_ref, v_ref, wq_ref, wk_ref, wv_ref, wfc_ref,
                o_ref, attn_ref, *, n_head, d_head, block_b, n_q, n_kv):
    """One grid step == `block_b` batch elements.

    Block shapes:
      q_ref             : (block_b * n_q,  C)   rows = flattened (batch, token)
      k_ref, v_ref      : (block_b * n_kv, C)
      wq/wk/wv/wfc_ref  : (C, C)  pre-transposed to (in, out); wq pre-scaled
      o_ref             : (block_b * n_q,  C)
      attn_ref          : (block_b, n_head, n_q, n_kv)
    """
    f32 = jnp.float32
    xq = q_ref[...]          # residual + projection input, kept in storage dtype
    xk = k_ref[...]
    xv = v_ref[...]

    # Fused-row projections over all block_b*N rows (one MXU sequence each).
    q_proj = jnp.dot(xq, wq_ref[...], preferred_element_type=f32)  # pre-scaled
    k_proj = jnp.dot(xk, wk_ref[...], preferred_element_type=f32)
    v_proj = jnp.dot(xv, wv_ref[...], preferred_element_type=f32)

    wfc = wfc_ref[...]
    # Per-head (d_head, C) row slices of fc weight, hoisted out of the loops.
    wfc_heads = [wfc[h * d_head:(h + 1) * d_head, :] for h in range(n_head)]

    qk_dims = (((1,), (1,)), ((), ()))   # contract dim 1 of q with dim 1 of k

    for b in range(block_b):                       # static unroll
        rq = b * n_q
        rk = b * n_kv
        out_b = xq[rq:rq + n_q, :].astype(f32)     # residual (pre-projection q)
        for h in range(n_head):                    # static unroll
            c0 = h * d_head
            q_bh = q_proj[rq:rq + n_q, c0:c0 + d_head]    # (n_q, d), scaled
            k_bh = k_proj[rk:rk + n_kv, c0:c0 + d_head]   # (n_kv, d)
            v_bh = v_proj[rk:rk + n_kv, c0:c0 + d_head]   # (n_kv, d)

            # scores = q_bh @ k_bh.T without materializing the transpose.
            s = lax.dot_general(q_bh, k_bh, qk_dims, preferred_element_type=f32)
            s = s - jnp.max(s, axis=-1, keepdims=True)
            e = jnp.exp(s)
            inv = pl.reciprocal(jnp.sum(e, axis=-1, keepdims=True), approx=True)
            attn = e * inv                                  # (n_q, n_kv), f32

            attn_ref[b, h] = attn.astype(attn_ref.dtype)

            ctx = jnp.dot(attn, v_bh, preferred_element_type=f32)   # (n_q, d)
            # Per-head fc contribution accumulated (no concatenate).
            out_b = out_b + jnp.dot(ctx.astype(wfc.dtype), wfc_heads[h],
                                    preferred_element_type=f32)
        o_ref[rq:rq + n_q, :] = out_b.astype(o_ref.dtype)


def multi_head_attention(q, k, v, w_qs, w_ks, w_vs, w_fc, n_head, *, block_b=None):
    """Pallas MultiHeadAttention forward (eval mode). Returns (output, attn)."""
    B, Nq, C = q.shape
    Bk, Nkv, Ck = k.shape
    assert v.shape == (Bk, Nkv, Ck) and Bk == B and Ck == C
    assert C % n_head == 0
    d_head = C // n_head
    inv_temp = 1.0 / (float(d_head) ** 0.5)

    # --- one-time weight prep (plain XLA, outside the kernel) ---------------
    # PyTorch Linear stores (out, in); pre-transpose to (in, out) so the kernel
    # computes y = x @ W with no in-kernel transpose, and fold the 1/temperature
    # scale into the query projection.  Weights cast to the activation dtype so
    # bf16 inputs get bf16 MXU operands (f32 accumulation kept in-kernel).
    cdt = q.dtype
    wq_t = (w_qs.T * inv_temp).astype(cdt)
    wk_t = w_ks.T.astype(cdt)
    wv_t = w_vs.T.astype(cdt)
    wfc_t = w_fc.T.astype(cdt)

    # --- batch blocking ------------------------------------------------------
    if block_b is None:
        # Pack enough (batch*token) rows per grid step to feed the MXU; for
        # small B this collapses the grid to a single step.  Must divide B.
        target = max(1, 256 // max(Nq, 1))
        block_b = 1
        for cand in range(1, B + 1):
            if B % cand == 0 and cand <= target:
                block_b = cand
    assert B % block_b == 0
    grid = (B // block_b,)

    # Flatten (batch, token) into rows in the wrapper (free layout change) so
    # the projections inside the kernel run over block_b*N rows at once.
    q2 = q.reshape(B * Nq, C)
    k2 = k.reshape(B * Nkv, C)
    v2 = v.reshape(B * Nkv, C)

    kernel = functools.partial(_mha_kernel, n_head=n_head, d_head=d_head,
                               block_b=block_b, n_q=Nq, n_kv=Nkv)

    row_q = block_b * Nq
    row_kv = block_b * Nkv
    w_spec = pl.BlockSpec((C, C), lambda i: (0, 0))

    itemsize = jnp.dtype(q.dtype).itemsize
    flops = int(2 * B * Nq * C * C               # q projection
                + 4 * B * Nkv * C * C            # k, v projections
                + 4 * B * n_head * Nq * Nkv * d_head   # scores + ctx
                + 2 * B * Nq * C * C)            # fc (per-head accumulated)
    transcendentals = int(B * n_head * Nq * (Nkv + 1))   # exp + reciprocal
    bytes_accessed = int((q2.size + k2.size + v2.size + 4 * C * C
                          + B * Nq * C) * itemsize
                         + B * n_head * Nq * Nkv * 4)

    out2, attn = pl.pallas_call(
        kernel,
        out_shape=(
            jax.ShapeDtypeStruct((B * Nq, C), q.dtype),
            jax.ShapeDtypeStruct((B, n_head, Nq, Nkv), jnp.float32),
        ),
        grid_spec=pltpu.PrefetchScalarGridSpec(
            num_scalar_prefetch=0,
            grid=grid,
            in_specs=[
                pl.BlockSpec((row_q, C), lambda i: (i, 0)),
                pl.BlockSpec((row_kv, C), lambda i: (i, 0)),
                pl.BlockSpec((row_kv, C), lambda i: (i, 0)),
                w_spec, w_spec, w_spec, w_spec,
            ],
            out_specs=(
                pl.BlockSpec((row_q, C), lambda i: (i, 0)),
                pl.BlockSpec((block_b, n_head, Nq, Nkv), lambda i: (i, 0, 0, 0)),
            ),
        ),
        compiler_params=pltpu.CompilerParams(
            dimension_semantics=("parallel",)),
        cost_estimate=pl.CostEstimate(
            flops=flops, transcendentals=transcendentals,
            bytes_accessed=bytes_accessed),
    )(q2, k2, v2, wq_t, wk_t, wv_t, wfc_t)

    return out2.reshape(B, Nq, C), attn


def _reference(q, k, v, w_qs, w_ks, w_vs, w_fc, n_head):
    """Pure-JAX reference mirroring the PyTorch forward (eval mode)."""
    B, Nq, C = q.shape
    _, Nkv, _ = k.shape
    d = C // n_head
    temp = float(d) ** 0.5
    residual = q

    def proj(x, w, n):
        return (x @ w.T).reshape(B, n, n_head, d).transpose(0, 2, 1, 3)

    qh = proj(q, w_qs, Nq)
    kh = proj(k, w_ks, Nkv)
    vh = proj(v, w_vs, Nkv)
    scores = jnp.einsum("bhqd,bhkd->bhqk", qh / temp, kh)
    attn = jax.nn.softmax(scores, axis=-1)
    out = jnp.einsum("bhqk,bhkd->bhqd", attn, vh)
    out = out.transpose(0, 2, 1, 3).reshape(B, Nq, C)
    out = out @ w_fc.T + residual
    return out, attn


if __name__ == "__main__":
    # Small shapes consistent with the module: B=2, N=8 tokens, C=32 channels, 4 heads
    B, N, C, n_head = 2, 8, 32, 4

    key = jax.random.PRNGKey(0)
    k0, k1, k2, k3, k4, k5, k6 = jax.random.split(key, 7)

    q = jax.random.normal(k0, (B, N, C), dtype=jnp.float32)
    k = jax.random.normal(k1, (B, N, C), dtype=jnp.float32)
    v = jax.random.normal(k2, (B, N, C), dtype=jnp.float32)

    # Deterministic weight init (PyTorch Linear layout: (out_features, in_features))
    scale = 1.0 / (C ** 0.5)
    w_qs = jax.random.uniform(k3, (C, C), minval=-scale, maxval=scale, dtype=jnp.float32)
    w_ks = jax.random.uniform(k4, (C, C), minval=-scale, maxval=scale, dtype=jnp.float32)
    w_vs = jax.random.uniform(k5, (C, C), minval=-scale, maxval=scale, dtype=jnp.float32)
    w_fc = jax.random.uniform(k6, (C, C), minval=-scale, maxval=scale, dtype=jnp.float32)

    out, attn = multi_head_attention(q, k, v, w_qs, w_ks, w_vs, w_fc, n_head)
    jax.block_until_ready((out, attn))

    out_ref, attn_ref = _reference(q, k, v, w_qs, w_ks, w_vs, w_fc, n_head)
    assert out.shape == (B, N, C) and attn.shape == (B, n_head, N, N)
    # Tolerance accounts for the EUP approximate reciprocal in the softmax
    # denominator (pl.reciprocal(..., approx=True)).
    assert jnp.allclose(out, out_ref, atol=5e-3, rtol=5e-3)
    assert jnp.allclose(attn, attn_ref, atol=5e-3, rtol=5e-3)

    print("KERNEL_OK")
</pallas_src>

<mosaic_0001>
module attributes {stable_mosaic.version = 11 : i64} {
  func.func @_mha_kernel(%arg0: i32, %arg1: memref<16x32xf32, #tpu.memory_space<vmem>>, %arg2: memref<16x32xf32, #tpu.memory_space<vmem>>, %arg3: memref<16x32xf32, #tpu.memory_space<vmem>>, %arg4: memref<32x32xf32, #tpu.memory_space<vmem>>, %arg5: memref<32x32xf32, #tpu.memory_space<vmem>>, %arg6: memref<32x32xf32, #tpu.memory_space<vmem>>, %arg7: memref<32x32xf32, #tpu.memory_space<vmem>>, %arg8: memref<16x32xf32, #tpu.memory_space<vmem>>, %arg9: memref<2x4x8x8xf32, #tpu.memory_space<vmem>>) attributes {dimension_semantics = [#tpu.dimension_semantics<parallel>], iteration_bounds = array<i64: 1>, scalar_prefetch = 0 : i64, scratch_operands = 0 : i64, tpu.core_type = #tpu.core_type<tc>, window_params = [{transform_indices = @transform_0, window_bounds = array<i64: 16, 32>}, {transform_indices = @transform_1, window_bounds = array<i64: 16, 32>}, {transform_indices = @transform_2, window_bounds = array<i64: 16, 32>}, {pipeline_mode = #tpu.pipeline_mode<synchronous>, transform_indices = @transform_3, window_bounds = array<i64: 32, 32>}, {pipeline_mode = #tpu.pipeline_mode<synchronous>, transform_indices = @transform_4, window_bounds = array<i64: 32, 32>}, {pipeline_mode = #tpu.pipeline_mode<synchronous>, transform_indices = @transform_5, window_bounds = array<i64: 32, 32>}, {pipeline_mode = #tpu.pipeline_mode<synchronous>, transform_indices = @transform_6, window_bounds = array<i64: 32, 32>}, {transform_indices = @transform_7, window_bounds = array<i64: 16, 32>}, {transform_indices = @transform_8, window_bounds = array<i64: 2, 4, 8, 8>}]} {
    %c0 = arith.constant 0 : index
    %c0_0 = arith.constant 0 : index
    %0 = vector.load %arg1[%c0, %c0_0] : memref<16x32xf32, #tpu.memory_space<vmem>>, vector<16x32xf32>
    %c0_1 = arith.constant 0 : index
    %c0_2 = arith.constant 0 : index
    %1 = vector.load %arg2[%c0_1, %c0_2] : memref<16x32xf32, #tpu.memory_space<vmem>>, vector<16x32xf32>
    %c0_3 = arith.constant 0 : index
    %c0_4 = arith.constant 0 : index
    %2 = vector.load %arg3[%c0_3, %c0_4] : memref<16x32xf32, #tpu.memory_space<vmem>>, vector<16x32xf32>
    %c0_5 = arith.constant 0 : index
    %c0_6 = arith.constant 0 : index
    %3 = vector.load %arg4[%c0_5, %c0_6] : memref<32x32xf32, #tpu.memory_space<vmem>>, vector<32x32xf32>
    %cst = arith.constant dense<0.000000e+00> : vector<16x32xf32>
    %4 = tpu.matmul %0, %3, %cst {dimension_numbers = #tpu.dot_dimension_numbers<[1], [0], [0], [1], [0, 0, 1, 1], [], []>} : vector<16x32xf32>, vector<32x32xf32>, vector<16x32xf32> -> vector<16x32xf32>
    %c0_7 = arith.constant 0 : index
    %c0_8 = arith.constant 0 : index
    %5 = vector.load %arg5[%c0_7, %c0_8] : memref<32x32xf32, #tpu.memory_space<vmem>>, vector<32x32xf32>
    %cst_9 = arith.constant dense<0.000000e+00> : vector<16x32xf32>
    %6 = tpu.matmul %1, %5, %cst_9 {dimension_numbers = #tpu.dot_dimension_numbers<[1], [0], [0], [1], [0, 0, 1, 1], [], []>} : vector<16x32xf32>, vector<32x32xf32>, vector<16x32xf32> -> vector<16x32xf32>
    %c0_10 = arith.constant 0 : index
    %c0_11 = arith.constant 0 : index
    %7 = vector.load %arg6[%c0_10, %c0_11] : memref<32x32xf32, #tpu.memory_space<vmem>>, vector<32x32xf32>
    %cst_12 = arith.constant dense<0.000000e+00> : vector<16x32xf32>
    %8 = tpu.matmul %2, %7, %cst_12 {dimension_numbers = #tpu.dot_dimension_numbers<[1], [0], [0], [1], [0, 0, 1, 1], [], []>} : vector<16x32xf32>, vector<32x32xf32>, vector<16x32xf32> -> vector<16x32xf32>
    %c0_13 = arith.constant 0 : index
    %c0_14 = arith.constant 0 : index
    %9 = vector.load %arg7[%c0_13, %c0_14] : memref<32x32xf32, #tpu.memory_space<vmem>>, vector<32x32xf32>
    %10 = vector.extract_strided_slice %9 {offsets = [0, 0], sizes = [8, 32], strides = [1, 1]} : vector<32x32xf32> to vector<8x32xf32>
    %11 = vector.extract_strided_slice %9 {offsets = [8, 0], sizes = [8, 32], strides = [1, 1]} : vector<32x32xf32> to vector<8x32xf32>
    %12 = vector.extract_strided_slice %9 {offsets = [16, 0], sizes = [8, 32], strides = [1, 1]} : vector<32x32xf32> to vector<8x32xf32>
    %13 = vector.extract_strided_slice %9 {offsets = [24, 0], sizes = [8, 32], strides = [1, 1]} : vector<32x32xf32> to vector<8x32xf32>
    %14 = vector.extract_strided_slice %0 {offsets = [0, 0], sizes = [8, 32], strides = [1, 1]} : vector<16x32xf32> to vector<8x32xf32>
    %15 = vector.extract_strided_slice %4 {offsets = [0, 0], sizes = [8, 8], strides = [1, 1]} : vector<16x32xf32> to vector<8x8xf32>
    %16 = vector.extract_strided_slice %6 {offsets = [0, 0], sizes = [8, 8], strides = [1, 1]} : vector<16x32xf32> to vector<8x8xf32>
    %17 = vector.extract_strided_slice %8 {offsets = [0, 0], sizes = [8, 8], strides = [1, 1]} : vector<16x32xf32> to vector<8x8xf32>
    %cst_15 = arith.constant dense<0.000000e+00> : vector<8x8xf32>
    %18 = tpu.matmul %15, %16, %cst_15 {dimension_numbers = #tpu.dot_dimension_numbers<[1], [1], [0], [0], [0, 0, 1, 0], [], []>} : vector<8x8xf32>, vector<8x8xf32>, vector<8x8xf32> -> vector<8x8xf32>
    %cst_16 = arith.constant dense<0xFF800000> : vector<8xf32>
    %19 = vector.multi_reduction <maximumf>, %18, %cst_16 [1] : vector<8x8xf32> to vector<8xf32>
    %20 = vector.shape_cast %19 : vector<8xf32> to vector<8x1xf32>
    %21 = vector.broadcast %20 : vector<8x1xf32> to vector<8x8xf32>
    %22 = arith.subf %18, %21 : vector<8x8xf32>
    %23 = math.exp %22 : vector<8x8xf32>
    %cst_17 = arith.constant dense<0.000000e+00> : vector<8xf32>
    %24 = vector.multi_reduction <add>, %23, %cst_17 [1] : vector<8x8xf32> to vector<8xf32>
    %25 = vector.shape_cast %24 : vector<8xf32> to vector<8x1xf32>
    %26 = tpu.reciprocal %25 {approx = true} : vector<8x1xf32> -> vector<8x1xf32>
    %27 = vector.broadcast %26 : vector<8x1xf32> to vector<8x8xf32>
    %28 = arith.mulf %23, %27 : vector<8x8xf32>
    %c0_18 = arith.constant 0 : index
    %c0_19 = arith.constant 0 : index
    %c0_20 = arith.constant 0 : index
    %c0_21 = arith.constant 0 : index
    %29 = vector.load %arg9[%c0_18, %c0_19, %c0_20, %c0_21] : memref<2x4x8x8xf32, #tpu.memory_space<vmem>>, vector<1x1x8x8xf32>
    %30 = vector.shape_cast %29 : vector<1x1x8x8xf32> to vector<8x8xf32>
    %31 = vector.shape_cast %28 : vector<8x8xf32> to vector<1x1x8x8xf32>
    tpu.vector_store %arg9[%c0_18, %c0_19, %c0_20, %c0_21], %31 {strides = array<i32>} : memref<2x4x8x8xf32, #tpu.memory_space<vmem>>, vector<1x1x8x8xf32>,
    %cst_22 = arith.constant dense<0.000000e+00> : vector<8x8xf32>
    %32 = tpu.matmul %28, %17, %cst_22 {dimension_numbers = #tpu.dot_dimension_numbers<[1], [0], [0], [1], [0, 0, 1, 1], [], []>} : vector<8x8xf32>, vector<8x8xf32>, vector<8x8xf32> -> vector<8x8xf32>
    %cst_23 = arith.constant dense<0.000000e+00> : vector<8x32xf32>
    %33 = tpu.matmul %32, %10, %cst_23 {dimension_numbers = #tpu.dot_dimension_numbers<[1], [0], [0], [1], [0, 0, 1, 1], [], []>} : vector<8x8xf32>, vector<8x32xf32>, vector<8x32xf32> -> vector<8x32xf32>
    %34 = arith.addf %14, %33 : vector<8x32xf32>
    %35 = vector.extract_strided_slice %4 {offsets = [0, 8], sizes = [8, 8], strides = [1, 1]} : vector<16x32xf32> to vector<8x8xf32>
    %36 = vector.extract_strided_slice %6 {offsets = [0, 8], sizes = [8, 8], strides = [1, 1]} : vector<16x32xf32> to vector<8x8xf32>
    %37 = vector.extract_strided_slice %8 {offsets = [0, 8], sizes = [8, 8], strides = [1, 1]} : vector<16x32xf32> to vector<8x8xf32>
    %cst_24 = arith.constant dense<0.000000e+00> : vector<8x8xf32>
    %38 = tpu.matmul %35, %36, %cst_24 {dimension_numbers = #tpu.dot_dimension_numbers<[1], [1], [0], [0], [0, 0, 1, 0], [], []>} : vector<8x8xf32>, vector<8x8xf32>, vector<8x8xf32> -> vector<8x8xf32>
    %cst_25 = arith.constant dense<0xFF800000> : vector<8xf32>
    %39 = vector.multi_reduction <maximumf>, %38, %cst_25 [1] : vector<8x8xf32> to vector<8xf32>
    %40 = vector.shape_cast %39 : vector<8xf32> to vector<8x1xf32>
    %41 = vector.broadcast %40 : vector<8x1xf32> to vector<8x8xf32>
    %42 = arith.subf %38, %41 : vector<8x8xf32>
    %43 = math.exp %42 : vector<8x8xf32>
    %cst_26 = arith.constant dense<0.000000e+00> : vector<8xf32>
    %44 = vector.multi_reduction <add>, %43, %cst_26 [1] : vector<8x8xf32> to vector<8xf32>
    %45 = vector.shape_cast %44 : vector<8xf32> to vector<8x1xf32>
    %46 = tpu.reciprocal %45 {approx = true} : vector<8x1xf32> -> vector<8x1xf32>
    %47 = vector.broadcast %46 : vector<8x1xf32> to vector<8x8xf32>
    %48 = arith.mulf %43, %47 : vector<8x8xf32>
    %c0_27 = arith.constant 0 : index
    %c1 = arith.constant 1 : index
    %c0_28 = arith.constant 0 : index
    %c0_29 = arith.constant 0 : index
    %49 = vector.load %arg9[%c0_27, %c1, %c0_28, %c0_29] : memref<2x4x8x8xf32, #tpu.memory_space<vmem>>, vector<1x1x8x8xf32>
    %50 = vector.shape_cast %49 : vector<1x1x8x8xf32> to vector<8x8xf32>
    %51 = vector.shape_cast %48 : vector<8x8xf32> to vector<1x1x8x8xf32>
    tpu.vector_store %arg9[%c0_27, %c1, %c0_28, %c0_29], %51 {strides = array<i32>} : memref<2x4x8x8xf32, #tpu.memory_space<vmem>>, vector<1x1x8x8xf32>,
    %cst_30 = arith.constant dense<0.000000e+00> : vector<8x8xf32>
    %52 = tpu.matmul %48, %37, %cst_30 {dimension_numbers = #tpu.dot_dimension_numbers<[1], [0], [0], [1], [0, 0, 1, 1], [], []>} : vector<8x8xf32>, vector<8x8xf32>, vector<8x8xf32> -> vector<8x8xf32>
    %cst_31 = arith.constant dense<0.000000e+00> : vector<8x32xf32>
    %53 = tpu.matmul %52, %11, %cst_31 {dimension_numbers = #tpu.dot_dimension_numbers<[1], [0], [0], [1], [0, 0, 1, 1], [], []>} : vector<8x8xf32>, vector<8x32xf32>, vector<8x32xf32> -> vector<8x32xf32>
    %54 = arith.addf %34, %53 : vector<8x32xf32>
    %55 = vector.extract_strided_slice %4 {offsets = [0, 16], sizes = [8, 8], strides = [1, 1]} : vector<16x32xf32> to vector<8x8xf32>
    %56 = vector.extract_strided_slice %6 {offsets = [0, 16], sizes = [8, 8], strides = [1, 1]} : vector<16x32xf32> to vector<8x8xf32>
    %57 = vector.extract_strided_slice %8 {offsets = [0, 16], sizes = [8, 8], strides = [1, 1]} : vector<16x32xf32> to vector<8x8xf32>
    %cst_32 = arith.constant dense<0.000000e+00> : vector<8x8xf32>
    %58 = tpu.matmul %55, %56, %cst_32 {dimension_numbers = #tpu.dot_dimension_numbers<[1], [1], [0], [0], [0, 0, 1, 0], [], []>} : vector<8x8xf32>, vector<8x8xf32>, vector<8x8xf32> -> vector<8x8xf32>
    %cst_33 = arith.constant dense<0xFF800000> : vector<8xf32>
    %59 = vector.multi_reduction <maximumf>, %58, %cst_33 [1] : vector<8x8xf32> to vector<8xf32>
    %60 = vector.shape_cast %59 : vector<8xf32> to vector<8x1xf32>
    %61 = vector.broadcast %60 : vector<8x1xf32> to vector<8x8xf32>
    %62 = arith.subf %58, %61 : vector<8x8xf32>
    %63 = math.exp %62 : vector<8x8xf32>
    %cst_34 = arith.constant dense<0.000000e+00> : vector<8xf32>
    %64 = vector.multi_reduction <add>, %63, %cst_34 [1] : vector<8x8xf32> to vector<8xf32>
    %65 = vector.shape_cast %64 : vector<8xf32> to vector<8x1xf32>
    %66 = tpu.reciprocal %65 {approx = true} : vector<8x1xf32> -> vector<8x1xf32>
    %67 = vector.broadcast %66 : vector<8x1xf32> to vector<8x8xf32>
    %68 = arith.mulf %63, %67 : vector<8x8xf32>
    %c0_35 = arith.constant 0 : index
    %c2 = arith.constant 2 : index
    %c0_36 = arith.constant 0 : index
    %c0_37 = arith.constant 0 : index
    %69 = vector.load %arg9[%c0_35, %c2, %c0_36, %c0_37] : memref<2x4x8x8xf32, #tpu.memory_space<vmem>>, vector<1x1x8x8xf32>
    %70 = vector.shape_cast %69 : vector<1x1x8x8xf32> to vector<8x8xf32>
    %71 = vector.shape_cast %68 : vector<8x8xf32> to vector<1x1x8x8xf32>
    tpu.vector_store %arg9[%c0_35, %c2, %c0_36, %c0_37], %71 {strides = array<i32>} : memref<2x4x8x8xf32, #tpu.memory_space<vmem>>, vector<1x1x8x8xf32>,
    %cst_38 = arith.constant dense<0.000000e+00> : vector<8x8xf32>
    %72 = tpu.matmul %68, %57, %cst_38 {dimension_numbers = #tpu.dot_dimension_numbers<[1], [0], [0], [1], [0, 0, 1, 1], [], []>} : vector<8x8xf32>, vector<8x8xf32>, vector<8x8xf32> -> vector<8x8xf32>
    %cst_39 = arith.constant dense<0.000000e+00> : vector<8x32xf32>
    %73 = tpu.matmul %72, %12, %cst_39 {dimension_numbers = #tpu.dot_dimension_numbers<[1], [0], [0], [1], [0, 0, 1, 1], [], []>} : vector<8x8xf32>, vector<8x32xf32>, vector<8x32xf32> -> vector<8x32xf32>
    %74 = arith.addf %54, %73 : vector<8x32xf32>
    %75 = vector.extract_strided_slice %4 {offsets = [0, 24], sizes = [8, 8], strides = [1, 1]} : vector<16x32xf32> to vector<8x8xf32>
    %76 = vector.extract_strided_slice %6 {offsets = [0, 24], sizes = [8, 8], strides = [1, 1]} : vector<16x32xf32> to vector<8x8xf32>
    %77 = vector.extract_strided_slice %8 {offsets = [0, 24], sizes = [8, 8], strides = [1, 1]} : vector<16x32xf32> to vector<8x8xf32>
    %cst_40 = arith.constant dense<0.000000e+00> : vector<8x8xf32>
    %78 = tpu.matmul %75, %76, %cst_40 {dimension_numbers = #tpu.dot_dimension_numbers<[1], [1], [0], [0], [0, 0, 1, 0], [], []>} : vector<8x8xf32>, vector<8x8xf32>, vector<8x8xf32> -> vector<8x8xf32>
    %cst_41 = arith.constant dense<0xFF800000> : vector<8xf32>
    %79 = vector.multi_reduction <maximumf>, %78, %cst_41 [1] : vector<8x8xf32> to vector<8xf32>
    %80 = vector.shape_cast %79 : vector<8xf32> to vector<8x1xf32>
    %81 = vector.broadcast %80 : vector<8x1xf32> to vector<8x8xf32>
    %82 = arith.subf %78, %81 : vector<8x8xf32>
    %83 = math.exp %82 : vector<8x8xf32>
    %cst_42 = arith.constant dense<0.000000e+00> : vector<8xf32>
    %84 = vector.multi_reduction <add>, %83, %cst_42 [1] : vector<8x8xf32> to vector<8xf32>
    %85 = vector.shape_cast %84 : vector<8xf32> to vector<8x1xf32>
    %86 = tpu.reciprocal %85 {approx = true} : vector<8x1xf32> -> vector<8x1xf32>
    %87 = vector.broadcast %86 : vector<8x1xf32> to vector<8x8xf32>
    %88 = arith.mulf %83, %87 : vector<8x8xf32>
    %c0_43 = arith.constant 0 : index
    %c3 = arith.constant 3 : index
    %c0_44 = arith.constant 0 : index
    %c0_45 = arith.constant 0 : index
    %89 = vector.load %arg9[%c0_43, %c3, %c0_44, %c0_45] : memref<2x4x8x8xf32, #tpu.memory_space<vmem>>, vector<1x1x8x8xf32>
    %90 = vector.shape_cast %89 : vector<1x1x8x8xf32> to vector<8x8xf32>
    %91 = vector.shape_cast %88 : vector<8x8xf32> to vector<1x1x8x8xf32>
    tpu.vector_store %arg9[%c0_43, %c3, %c0_44, %c0_45], %91 {strides = array<i32>} : memref<2x4x8x8xf32, #tpu.memory_space<vmem>>, vector<1x1x8x8xf32>,
    %cst_46 = arith.constant dense<0.000000e+00> : vector<8x8xf32>
    %92 = tpu.matmul %88, %77, %cst_46 {dimension_numbers = #tpu.dot_dimension_numbers<[1], [0], [0], [1], [0, 0, 1, 1], [], []>} : vector<8x8xf32>, vector<8x8xf32>, vector<8x8xf32> -> vector<8x8xf32>
    %cst_47 = arith.constant dense<0.000000e+00> : vector<8x32xf32>
    %93 = tpu.matmul %92, %13, %cst_47 {dimension_numbers = #tpu.dot_dimension_numbers<[1], [0], [0], [1], [0, 0, 1, 1], [], []>} : vector<8x8xf32>, vector<8x32xf32>, vector<8x32xf32> -> vector<8x32xf32>
    %94 = arith.addf %74, %93 : vector<8x32xf32>
    %c0_48 = arith.constant 0 : index
    %c0_49 = arith.constant 0 : index
    %95 = vector.load %arg8[%c0_48, %c0_49] : memref<16x32xf32, #tpu.memory_space<vmem>>, vector<8x32xf32>
    tpu.vector_store %arg8[%c0_48, %c0_49], %94 {strides = array<i32>} : memref<16x32xf32, #tpu.memory_space<vmem>>, vector<8x32xf32>,
    %96 = vector.extract_strided_slice %0 {offsets = [8, 0], sizes = [8, 32], strides = [1, 1]} : vector<16x32xf32> to vector<8x32xf32>
    %97 = vector.extract_strided_slice %4 {offsets = [8, 0], sizes = [8, 8], strides = [1, 1]} : vector<16x32xf32> to vector<8x8xf32>
    %98 = vector.extract_strided_slice %6 {offsets = [8, 0], sizes = [8, 8], strides = [1, 1]} : vector<16x32xf32> to vector<8x8xf32>
    %99 = vector.extract_strided_slice %8 {offsets = [8, 0], sizes = [8, 8], strides = [1, 1]} : vector<16x32xf32> to vector<8x8xf32>
    %cst_50 = arith.constant dense<0.000000e+00> : vector<8x8xf32>
    %100 = tpu.matmul %97, %98, %cst_50 {dimension_numbers = #tpu.dot_dimension_numbers<[1], [1], [0], [0], [0, 0, 1, 0], [], []>} : vector<8x8xf32>, vector<8x8xf32>, vector<8x8xf32> -> vector<8x8xf32>
    %cst_51 = arith.constant dense<0xFF800000> : vector<8xf32>
    %101 = vector.multi_reduction <maximumf>, %100, %cst_51 [1] : vector<8x8xf32> to vector<8xf32>
    %102 = vector.shape_cast %101 : vector<8xf32> to vector<8x1xf32>
    %103 = vector.broadcast %102 : vector<8x1xf32> to vector<8x8xf32>
    %104 = arith.subf %100, %103 : vector<8x8xf32>
    %105 = math.exp %104 : vector<8x8xf32>
    %cst_52 = arith.constant dense<0.000000e+00> : vector<8xf32>
    %106 = vector.multi_reduction <add>, %105, %cst_52 [1] : vector<8x8xf32> to vector<8xf32>
    %107 = vector.shape_cast %106 : vector<8xf32> to vector<8x1xf32>
    %108 = tpu.reciprocal %107 {approx = true} : vector<8x1xf32> -> vector<8x1xf32>
    %109 = vector.broadcast %108 : vector<8x1xf32> to vector<8x8xf32>
    %110 = arith.mulf %105, %109 : vector<8x8xf32>
    %c1_53 = arith.constant 1 : index
    %c0_54 = arith.constant 0 : index
    %c0_55 = arith.constant 0 : index
    %c0_56 = arith.constant 0 : index
    %111 = vector.load %arg9[%c1_53, %c0_54, %c0_55, %c0_56] : memref<2x4x8x8xf32, #tpu.memory_space<vmem>>, vector<1x1x8x8xf32>
    %112 = vector.shape_cast %111 : vector<1x1x8x8xf32> to vector<8x8xf32>
    %113 = vector.shape_cast %110 : vector<8x8xf32> to vector<1x1x8x8xf32>
    tpu.vector_store %arg9[%c1_53, %c0_54, %c0_55, %c0_56], %113 {strides = array<i32>} : memref<2x4x8x8xf32, #tpu.memory_space<vmem>>, vector<1x1x8x8xf32>,
    %cst_57 = arith.constant dense<0.000000e+00> : vector<8x8xf32>
    %114 = tpu.matmul %110, %99, %cst_57 {dimension_numbers = #tpu.dot_dimension_numbers<[1], [0], [0], [1], [0, 0, 1, 1], [], []>} : vector<8x8xf32>, vector<8x8xf32>, vector<8x8xf32> -> vector<8x8xf32>
    %cst_58 = arith.constant dense<0.000000e+00> : vector<8x32xf32>
    %115 = tpu.matmul %114, %10, %cst_58 {dimension_numbers = #tpu.dot_dimension_numbers<[1], [0], [0], [1], [0, 0, 1, 1], [], []>} : vector<8x8xf32>, vector<8x32xf32>, vector<8x32xf32> -> vector<8x32xf32>
    %116 = arith.addf %96, %115 : vector<8x32xf32>
    %117 = vector.extract_strided_slice %4 {offsets = [8, 8], sizes = [8, 8], strides = [1, 1]} : vector<16x32xf32> to vector<8x8xf32>
    %118 = vector.extract_strided_slice %6 {offsets = [8, 8], sizes = [8, 8], strides = [1, 1]} : vector<16x32xf32> to vector<8x8xf32>
    %119 = vector.extract_strided_slice %8 {offsets = [8, 8], sizes = [8, 8], strides = [1, 1]} : vector<16x32xf32> to vector<8x8xf32>
    %cst_59 = arith.constant dense<0.000000e+00> : vector<8x8xf32>
    %120 = tpu.matmul %117, %118, %cst_59 {dimension_numbers = #tpu.dot_dimension_numbers<[1], [1], [0], [0], [0, 0, 1, 0], [], []>} : vector<8x8xf32>, vector<8x8xf32>, vector<8x8xf32> -> vector<8x8xf32>
    %cst_60 = arith.constant dense<0xFF800000> : vector<8xf32>
    %121 = vector.multi_reduction <maximumf>, %120, %cst_60 [1] : vector<8x8xf32> to vector<8xf32>
    %122 = vector.shape_cast %121 : vector<8xf32> to vector<8x1xf32>
    %123 = vector.broadcast %122 : vector<8x1xf32> to vector<8x8xf32>
    %124 = arith.subf %120, %123 : vector<8x8xf32>
    %125 = math.exp %124 : vector<8x8xf32>
    %cst_61 = arith.constant dense<0.000000e+00> : vector<8xf32>
    %126 = vector.multi_reduction <add>, %125, %cst_61 [1] : vector<8x8xf32> to vector<8xf32>
    %127 = vector.shape_cast %126 : vector<8xf32> to vector<8x1xf32>
    %128 = tpu.reciprocal %127 {approx = true} : vector<8x1xf32> -> vector<8x1xf32>
    %129 = vector.broadcast %128 : vector<8x1xf32> to vector<8x8xf32>
    %130 = arith.mulf %125, %129 : vector<8x8xf32>
    %c1_62 = arith.constant 1 : index
    %c1_63 = arith.constant 1 : index
    %c0_64 = arith.constant 0 : index
    %c0_65 = arith.constant 0 : index
    %131 = vector.load %arg9[%c1_62, %c1_63, %c0_64, %c0_65] : memref<2x4x8x8xf32, #tpu.memory_space<vmem>>, vector<1x1x8x8xf32>
    %132 = vector.shape_cast %131 : vector<1x1x8x8xf32> to vector<8x8xf32>
    %133 = vector.shape_cast %130 : vector<8x8xf32> to vector<1x1x8x8xf32>
    tpu.vector_store %arg9[%c1_62, %c1_63, %c0_64, %c0_65], %133 {strides = array<i32>} : memref<2x4x8x8xf32, #tpu.memory_space<vmem>>, vector<1x1x8x8xf32>,
    %cst_66 = arith.constant dense<0.000000e+00> : vector<8x8xf32>
    %134 = tpu.matmul %130, %119, %cst_66 {dimension_numbers = #tpu.dot_dimension_numbers<[1], [0], [0], [1], [0, 0, 1, 1], [], []>} : vector<8x8xf32>, vector<8x8xf32>, vector<8x8xf32> -> vector<8x8xf32>
    %cst_67 = arith.constant dense<0.000000e+00> : vector<8x32xf32>
    %135 = tpu.matmul %134, %11, %cst_67 {dimension_numbers = #tpu.dot_dimension_numbers<[1], [0], [0], [1], [0, 0, 1, 1], [], []>} : vector<8x8xf32>, vector<8x32xf32>, vector<8x32xf32> -> vector<8x32xf32>
    %136 = arith.addf %116, %135 : vector<8x32xf32>
    %137 = vector.extract_strided_slice %4 {offsets = [8, 16], sizes = [8, 8], strides = [1, 1]} : vector<16x32xf32> to vector<8x8xf32>
    %138 = vector.extract_strided_slice %6 {offsets = [8, 16], sizes = [8, 8], strides = [1, 1]} : vector<16x32xf32> to vector<8x8xf32>
    %139 = vector.extract_strided_slice %8 {offsets = [8, 16], sizes = [8, 8], strides = [1, 1]} : vector<16x32xf32> to vector<8x8xf32>
    %cst_68 = arith.constant dense<0.000000e+00> : vector<8x8xf32>
    %140 = tpu.matmul %137, %138, %cst_68 {dimension_numbers = #tpu.dot_dimension_numbers<[1], [1], [0], [0], [0, 0, 1, 0], [], []>} : vector<8x8xf32>, vector<8x8xf32>, vector<8x8xf32> -> vector<8x8xf32>
    %cst_69 = arith.constant dense<0xFF800000> : vector<8xf32>
    %141 = vector.multi_reduction <maximumf>, %140, %cst_69 [1] : vector<8x8xf32> to vector<8xf32>
    %142 = vector.shape_cast %141 : vector<8xf32> to vector<8x1xf32>
    %143 = vector.broadcast %142 : vector<8x1xf32> to vector<8x8xf32>
    %144 = arith.subf %140, %143 : vector<8x8xf32>
    %145 = math.exp %144 : vector<8x8xf32>
    %cst_70 = arith.constant dense<0.000000e+00> : vector<8xf32>
    %146 = vector.multi_reduction <add>, %145, %cst_70 [1] : vector<8x8xf32> to vector<8xf32>
    %147 = vector.shape_cast %146 : vector<8xf32> to vector<8x1xf32>
    %148 = tpu.reciprocal %147 {approx = true} : vector<8x1xf32> -> vector<8x1xf32>
    %149 = vector.broadcast %148 : vector<8x1xf32> to vector<8x8xf32>
    %150 = arith.mulf %145, %149 : vector<8x8xf32>
    %c1_71 = arith.constant 1 : index
    %c2_72 = arith.constant 2 : index
    %c0_73 = arith.constant 0 : index
    %c0_74 = arith.constant 0 : index
    %151 = vector.load %arg9[%c1_71, %c2_72, %c0_73, %c0_74] : memref<2x4x8x8xf32, #tpu.memory_space<vmem>>, vector<1x1x8x8xf32>
    %152 = vector.shape_cast %151 : vector<1x1x8x8xf32> to vector<8x8xf32>
    %153 = vector.shape_cast %150 : vector<8x8xf32> to vector<1x1x8x8xf32>
    tpu.vector_store %arg9[%c1_71, %c2_72, %c0_73, %c0_74], %153 {strides = array<i32>} : memref<2x4x8x8xf32, #tpu.memory_space<vmem>>, vector<1x1x8x8xf32>,
    %cst_75 = arith.constant dense<0.000000e+00> : vector<8x8xf32>
    %154 = tpu.matmul %150, %139, %cst_75 {dimension_numbers = #tpu.dot_dimension_numbers<[1], [0], [0], [1], [0, 0, 1, 1], [], []>} : vector<8x8xf32>, vector<8x8xf32>, vector<8x8xf32> -> vector<8x8xf32>
    %cst_76 = arith.constant dense<0.000000e+00> : vector<8x32xf32>
    %155 = tpu.matmul %154, %12, %cst_76 {dimension_numbers = #tpu.dot_dimension_numbers<[1], [0], [0], [1], [0, 0, 1, 1], [], []>} : vector<8x8xf32>, vector<8x32xf32>, vector<8x32xf32> -> vector<8x32xf32>
    %156 = arith.addf %136, %155 : vector<8x32xf32>
    %157 = vector.extract_strided_slice %4 {offsets = [8, 24], sizes = [8, 8], strides = [1, 1]} : vector<16x32xf32> to vector<8x8xf32>
    %158 = vector.extract_strided_slice %6 {offsets = [8, 24], sizes = [8, 8], strides = [1, 1]} : vector<16x32xf32> to vector<8x8xf32>
    %159 = vector.extract_strided_slice %8 {offsets = [8, 24], sizes = [8, 8], strides = [1, 1]} : vector<16x32xf32> to vector<8x8xf32>
    %cst_77 = arith.constant dense<0.000000e+00> : vector<8x8xf32>
    %160 = tpu.matmul %157, %158, %cst_77 {dimension_numbers = #tpu.dot_dimension_numbers<[1], [1], [0], [0], [0, 0, 1, 0], [], []>} : vector<8x8xf32>, vector<8x8xf32>, vector<8x8xf32> -> vector<8x8xf32>
    %cst_78 = arith.constant dense<0xFF800000> : vector<8xf32>
    %161 = vector.multi_reduction <maximumf>, %160, %cst_78 [1] : vector<8x8xf32> to vector<8xf32>
    %162 = vector.shape_cast %161 : vector<8xf32> to vector<8x1xf32>
    %163 = vector.broadcast %162 : vector<8x1xf32> to vector<8x8xf32>
    %164 = arith.subf %160, %163 : vector<8x8xf32>
    %165 = math.exp %164 : vector<8x8xf32>
    %cst_79 = arith.constant dense<0.000000e+00> : vector<8xf32>
    %166 = vector.multi_reduction <add>, %165, %cst_79 [1] : vector<8x8xf32> to vector<8xf32>
    %167 = vector.shape_cast %166 : vector<8xf32> to vector<8x1xf32>
    %168 = tpu.reciprocal %167 {approx = true} : vector<8x1xf32> -> vector<8x1xf32>
    %169 = vector.broadcast %168 : vector<8x1xf32> to vector<8x8xf32>
    %170 = arith.mulf %165, %169 : vector<8x8xf32>
    %c1_80 = arith.constant 1 : index
    %c3_81 = arith.constant 3 : index
    %c0_82 = arith.constant 0 : index
    %c0_83 = arith.constant 0 : index
    %171 = vector.load %arg9[%c1_80, %c3_81, %c0_82, %c0_83] : memref<2x4x8x8xf32, #tpu.memory_space<vmem>>, vector<1x1x8x8xf32>
    %172 = vector.shape_cast %171 : vector<1x1x8x8xf32> to vector<8x8xf32>
    %173 = vector.shape_cast %170 : vector<8x8xf32> to vector<1x1x8x8xf32>
    tpu.vector_store %arg9[%c1_80, %c3_81, %c0_82, %c0_83], %173 {strides = array<i32>} : memref<2x4x8x8xf32, #tpu.memory_space<vmem>>, vector<1x1x8x8xf32>,
    %cst_84 = arith.constant dense<0.000000e+00> : vector<8x8xf32>
    %174 = tpu.matmul %170, %159, %cst_84 {dimension_numbers = #tpu.dot_dimension_numbers<[1], [0], [0], [1], [0, 0, 1, 1], [], []>} : vector<8x8xf32>, vector<8x8xf32>, vector<8x8xf32> -> vector<8x8xf32>
    %cst_85 = arith.constant dense<0.000000e+00> : vector<8x32xf32>
    %175 = tpu.matmul %174, %13, %cst_85 {dimension_numbers = #tpu.dot_dimension_numbers<[1], [0], [0], [1], [0, 0, 1, 1], [], []>} : vector<8x8xf32>, vector<8x32xf32>, vector<8x32xf32> -> vector<8x32xf32>
    %176 = arith.addf %156, %175 : vector<8x32xf32>
    %c8 = arith.constant 8 : index
    %c0_86 = arith.constant 0 : index
    %177 = vector.load %arg8[%c8, %c0_86] : memref<16x32xf32, #tpu.memory_space<vmem>>, vector<8x32xf32>
    tpu.vector_store %arg8[%c8, %c0_86], %176 {strides = array<i32>} : memref<16x32xf32, #tpu.memory_space<vmem>>, vector<8x32xf32>,
    return
  }
  func.func @transform_0(%arg0: i32) -> (i32, i32) {
    %c0_i32 = arith.constant 0 : i32
    %c0_i32_0 = arith.constant 0 : i32
    return %arg0, %c0_i32 : i32, i32
  }
  func.func @transform_1(%arg0: i32) -> (i32, i32) {
    %c0_i32 = arith.constant 0 : i32
    %c0_i32_0 = arith.constant 0 : i32
    return %arg0, %c0_i32 : i32, i32
  }
  func.func @transform_2(%arg0: i32) -> (i32, i32) {
    %c0_i32 = arith.constant 0 : i32
    %c0_i32_0 = arith.constant 0 : i32
    return %arg0, %c0_i32 : i32, i32
  }
  func.func @transform_3(%arg0: i32) -> (i32, i32) {
    %c0_i32 = arith.constant 0 : i32
    %c0_i32_0 = arith.constant 0 : i32
    %c0_i32_1 = arith.constant 0 : i32
    return %c0_i32, %c0_i32_0 : i32, i32
  }
  func.func @transform_4(%arg0: i32) -> (i32, i32) {
    %c0_i32 = arith.constant 0 : i32
    %c0_i32_0 = arith.constant 0 : i32
    %c0_i32_1 = arith.constant 0 : i32
    return %c0_i32, %c0_i32_0 : i32, i32
  }
  func.func @transform_5(%arg0: i32) -> (i32, i32) {
    %c0_i32 = arith.constant 0 : i32
    %c0_i32_0 = arith.constant 0 : i32
    %c0_i32_1 = arith.constant 0 : i32
    return %c0_i32, %c0_i32_0 : i32, i32
  }
  func.func @transform_6(%arg0: i32) -> (i32, i32) {
    %c0_i32 = arith.constant 0 : i32
    %c0_i32_0 = arith.constant 0 : i32
    %c0_i32_1 = arith.constant 0 : i32
    return %c0_i32, %c0_i32_0 : i32, i32
  }
  func.func @transform_7(%arg0: i32) -> (i32, i32) {
    %c0_i32 = arith.constant 0 : i32
    %c0_i32_0 = arith.constant 0 : i32
    return %arg0, %c0_i32 : i32, i32
  }
  func.func @transform_8(%arg0: i32) -> (i32, i32, i32, i32) {
    %c0_i32 = arith.constant 0 : i32
    %c0_i32_0 = arith.constant 0 : i32
    %c0_i32_1 = arith.constant 0 : i32
    %c0_i32_2 = arith.constant 0 : i32
    return %arg0, %c0_i32, %c0_i32_0, %c0_i32_1 : i32, i32, i32, i32
  }
}

</mosaic_0001>

<bundles_post_ra>
// kernel: tpu_custom_call.1
= control target key start
LH: loop header
LB: loop body
LE: loop exit
PB: predicated region body
PF: predicated region fallthrough
CT: control target
= control target key end

     0   :  { %14 = vsyncpa [#allocation3], 0  ;;  %s3175_s0 = inlined_call_operand.hbm [shape: f32[16,32], index: 0, kind: input, shape index: {}]   ;;  %s3176_s1 = inlined_call_operand.hbm [shape: f32[16,32], index: 1, kind: input, shape index: {}]   ;;  %s3177_s2 = inlined_call_operand.hbm [shape: f32[16,32], index: 2, kind: input, shape index: {}]   ;;  %s3178_s3 = inlined_call_operand.hbm [shape: f32[32,32], index: 3, kind: input, shape index: {}]   ;;  %s3179_s4 = inlined_call_operand.hbm [shape: f32[32,32], index: 4, kind: input, shape index: {}]   ;;  %s3180_s5 = inlined_call_operand.hbm [shape: f32[32,32], index: 5, kind: input, shape index: {}]   ;;  %s3181_s6 = inlined_call_operand.hbm [shape: f32[32,32], index: 6, kind: input, shape index: {}]   ;;  %s3182_s7 = inlined_call_operand.hbm [shape: f32[16,32], index: 7, kind: output, shape index: {0}]   ;;  %s3183_s8 = inlined_call_operand.hbm [shape: f32[2,4,8,8], index: 8, kind: output, shape index: {1}]  }
   0x1   :  { %15 = vsyncpa [#allocation6], 0 }
   0x2   :  { %16 = vsyncpa [#allocation9], 0 }
   0x3   :  { %17 = vsyncpa [#allocation12], 0 }
   0x4   :  { %18 = vsyncpa [#allocation4], 0 }
   0x5   :  { %19 = vsyncpa [#allocation16], 0  ;;  %s2846_s27 = smov [#allocation5]   ;;  %s2847_s29 = smov [#allocation8]  }
   0x6   :  { %s37_s28 = sshll.u32 %s2846_s27, 4  ;;  %s61_s30 = sshll.u32 %s2847_s29, 4  ;;  %s38_s28 = int_to_ptr.vmem [resolvable:$true] %s37_s28  ;;  %s62_s30 = int_to_ptr.vmem [resolvable:$true] %s61_s30 }
   0x7   :  { %s2662_s9 = scalar_lea.vmem %s38_s28, 256  ;;  %p2667_p1 = scmp.lt.s32.totalorder %s38_s28, %s38_s28 }
   0x8   :  { %p2663_p0 = scmp.ne.s32.totalorder %s38_s28, %s2662_s9  ;;  %p2668_p2 = scmp.lt.s32.totalorder %s2662_s9, %s2662_s9 }
   0xa   :  { %p2669_p3 = por %p2668_p2, %p2667_p1 }
   0xc   :  { %p2670_p4 = pnand %p2669_p3, %p2663_p0 }
   0xe   :  { %2673 = shalt.err (!%p2670_p4)
}
   0xf   :  { %s2848_s10 = smov 128   ;;  %s2849_s11 = smov 8  }
  0x10   :  { %43 = dma.hbm_to_vmem [thread:$0]  %s3176_s1, 256, %s38_s28, [#allocation6], %s2848_s10, %s2848_s10, %s2849_s11  }
  0x11   :  { %s2682_s14 = scalar_lea.vmem %s62_s30, 512  ;;  %p2687_p6 = scmp.lt.s32.totalorder %s62_s30, %s62_s30 }
  0x12   :  { %p2683_p5 = scmp.ne.s32.totalorder %s62_s30, %s2682_s14  ;;  %p2688_p7 = scmp.lt.s32.totalorder %s2682_s14, %s2682_s14 }
  0x14   :  { %p2689_p8 = por %p2688_p7, %p2687_p6 }
  0x16   :  { %p2690_p9 = pnand %p2689_p8, %p2683_p5 }
  0x18   :  { %2693 = shalt.err (!%p2690_p9)
}
  0x19   :  { %67 = dma.hbm_to_vmem [thread:$0]  %s3178_s3, 512, %s62_s30, [#allocation9], %s2848_s10, %s2848_s10, %s2849_s11  }
  0x1a   :  { %s2850_s17 = smov [#allocation11]   ;;  %s2851_s19 = smov [#allocation2]  }
  0x1b   :  { %s85_s18 = sshll.u32 %s2850_s17, 4  ;;  %s25_s20 = sshll.u32 %s2851_s19, 4  ;;  %s86_s18 = int_to_ptr.vmem [resolvable:$true] %s85_s18  ;;  %s26_s20 = int_to_ptr.vmem [resolvable:$true] %s25_s20 }
  0x1c   :  { %s2702_s1 = scalar_lea.vmem %s86_s18, 512  ;;  %p2707_p11 = scmp.lt.s32.totalorder %s86_s18, %s86_s18 }
  0x1d   :  { %p2703_p10 = scmp.ne.s32.totalorder %s86_s18, %s2702_s1  ;;  %p2708_p12 = scmp.lt.s32.totalorder %s2702_s1, %s2702_s1 }
  0x1f   :  { %p2709_p13 = por %p2708_p12, %p2707_p11 }
  0x21   :  { %p2710_p0 = pnand %p2709_p13, %p2703_p10 }
  0x23   :  { %2713 = shalt.err (!%p2710_p0)
}
  0x24   :  { %91 = dma.hbm_to_vmem [thread:$0]  %s3180_s5, 512, %s86_s18, [#allocation12], %s2848_s10, %s2848_s10, %s2849_s11  }
  0x25   :  { %s2722_s3 = scalar_lea.vmem %s26_s20, 256  ;;  %p2727_p2 = scmp.lt.s32.totalorder %s26_s20, %s26_s20 }
  0x26   :  { %p2723_p1 = scmp.ne.s32.totalorder %s26_s20, %s2722_s3  ;;  %p2728_p3 = scmp.lt.s32.totalorder %s2722_s3, %s2722_s3 }
  0x28   :  { %p2729_p4 = por %p2728_p3, %p2727_p2 }
  0x2a   :  { %p2730_p5 = pnand %p2729_p4, %p2723_p1 }
  0x2c   :  { %2733 = shalt.err (!%p2730_p5)
}
  0x2d   :  { %31 = dma.hbm_to_vmem [thread:$0]  %s3175_s0, 256, %s26_s20, [#allocation3], %s2848_s10, %s2848_s10, %s2849_s11  }
  0x2e   :  { %s2852_s25 = smov [#allocation7]   ;;  %s2853_s27 = smov [#allocation10]  }
  0x2f   :  { %s49_s26 = sshll.u32 %s2852_s25, 4  ;;  %s73_s28 = sshll.u32 %s2853_s27, 4  ;;  %s50_s26 = int_to_ptr.vmem [resolvable:$true] %s49_s26  ;;  %s74_s28 = int_to_ptr.vmem [resolvable:$true] %s73_s28 }
  0x30   :  { %s2742_s5 = scalar_lea.vmem %s50_s26, 256  ;;  %p2747_p7 = scmp.lt.s32.totalorder %s50_s26, %s50_s26 }
  0x31   :  { %p2743_p6 = scmp.ne.s32.totalorder %s50_s26, %s2742_s5  ;;  %p2748_p8 = scmp.lt.s32.totalorder %s2742_s5, %s2742_s5 }
  0x33   :  { %p2749_p9 = por %p2748_p8, %p2747_p7 }
  0x35   :  { %p2750_p10 = pnand %p2749_p9, %p2743_p6 }
  0x37   :  { %2753 = shalt.err (!%p2750_p10)
}
  0x38   :  { %55 = dma.hbm_to_vmem [thread:$0]  %s3177_s2, 256, %s50_s26, [#allocation6], %s2848_s10, %s2848_s10, %s2849_s11  }
  0x39   :  { %s2762_s0 = scalar_lea.vmem %s74_s28, 512  ;;  %p2767_p12 = scmp.lt.s32.totalorder %s74_s28, %s74_s28 }
  0x3a   :  { %p2763_p11 = scmp.ne.s32.totalorder %s74_s28, %s2762_s0  ;;  %p2768_p13 = scmp.lt.s32.totalorder %s2762_s0, %s2762_s0 }
  0x3c   :  { %p2769_p0 = por %p2768_p13, %p2767_p12 }
  0x3e   :  { %p2770_p1 = pnand %p2769_p0, %p2763_p11 }
  0x40   :  { %2773 = shalt.err (!%p2770_p1)
}
  0x41   :  { %79 = dma.hbm_to_vmem [thread:$0]  %s3179_s4, 512, %s74_s28, [#allocation9], %s2848_s10, %s2848_s10, %s2849_s11  }
  0x42   :  { %s2854_s13 = smov [#allocation13]  }
  0x43   :  { %s97_s14 = sshll.u32 %s2854_s13, 4  ;;  %s98_s14 = int_to_ptr.vmem [resolvable:$true] %s97_s14 }
  0x44   :  { %s2782_s15 = scalar_lea.vmem %s98_s14, 512  ;;  %p2787_p3 = scmp.lt.s32.totalorder %s98_s14, %s98_s14 }
  0x45   :  { %p2783_p2 = scmp.ne.s32.totalorder %s98_s14, %s2782_s15  ;;  %p2788_p4 = scmp.lt.s32.totalorder %s2782_s15, %s2782_s15 }
  0x47   :  { %p2789_p5 = por %p2788_p4, %p2787_p3 }
  0x49   :  { %p2790_p6 = pnand %p2789_p5, %p2783_p2 }
  0x4b   :  { %2793 = shalt.err (!%p2790_p6)
}
  0x4c   :  { %103 = dma.hbm_to_vmem [thread:$0]  %s3181_s6, 512, %s98_s14, [#allocation12], %s2848_s10, %s2848_s10, %s2849_s11  }
  0x4d   :  { %2834 = dma.done.wait [#allocation3], 256  }
  0x4e   :  { %2835 = vsyncadd [#allocation3], 4294967040 }
  0x4f   :  { %2836 = dma.done.wait [#allocation6], 512  }
  0x50   :  { %2837 = vsyncadd [#allocation6], 4294966784 }
  0x51   :  { %2838 = dma.done.wait [#allocation9], 1024  }
  0x52   :  { %2839 = vsyncadd [#allocation9], 4294966272 }
  0x53   :  { %2840 = dma.done.wait [#allocation12], 1024  }
  0x54   :  { %2841 = vsyncadd [#allocation12], 4294966272  ;;  %v220_v0 = vld [vmem:[#allocation10 + $0x18] sm:$0xff]  ;;  %v219_v2 = vld [vmem:[#allocation10 + $0x10] sm:$0xff]  ;;  %vm135_vm0 = vcmask 261120   ;;  %v2855_v12 = vmov 0.0  }
  0x55   :  { %v134_v1 = vld [vmem:[#allocation8 + $0x18] sm:$0xff]  ;;  %2464 = vmatprep.subr.mxu1 %v220_v0  ;;  %v133_v3 = vld [vmem:[#allocation8 + $0x10] sm:$0xff]  ;;  %v218_v4 = vld [vmem:[#allocation10 + $0x8] sm:$0xff]  ;;  %vm2856_vm1 = vmmov 0   ;;  %vm391_vm2 = vcmask 64512   ;;  %s2857_s4 = smov 120  }
  0x56   :  { %2453 = vmatprep.subr.mxu0 %v134_v1  ;;  %2465 = vmatpush3.msra.mxu1 %v220_v0  ;;  %v132_v5 = vld [vmem:[#allocation8 + $0x8] sm:$0xff]  ;;  %v217_v6 = vld [vmem:[#allocation10] sm:$0xff]  ;;  %v2950_v10 = vld [vmem:[#allocation2] sm:$0xff]  ;;  %s2858_s6 = smov 112   ;;  %s2859_s17 = smov 104  }
  0x57   :  { %2454 = vmatpush3.msra.mxu0 %v134_v1  ;;  %2466 = vmatprep.subr.mxu1 %v219_v2  ;;  %v127_v7 = vld [vmem:[#allocation5] sm:$0xff]  ;;  %v128_v9 = vld [vmem:[#allocation5 + $0x8] sm:$0xff]  ;;  %v2952_v11 = vld [vmem:[#allocation2 + $0x8] sm:$0xff]  ;;  %s2860_s18 = smov [#allocation15]  }
  0x58   :  { %2455 = vmatprep.subr.mxu0 %v133_v3  ;;  %2467 = vmatpush3.msra.mxu1 %v219_v2  ;;  %v131_v8 = vld [vmem:[#allocation8] sm:$0xff]  ;;  %v305_v17 = vld [vmem:[#allocation11 + $0x18] sm:$0xff]  ;;  %v304_v18 = vld [vmem:[#allocation11 + $0x10] sm:$0xff]  ;;  %s2330_s19 = sshll.u32 %s2860_s18, 4  ;;  %s2331_s19 = int_to_ptr.vmem [resolvable:$true] %s2330_s19 }
  0x59   :  { %2456 = vmatpush3.msra.mxu0 %v133_v3  ;;  %2468 = vmatprep.subr.mxu1 %v218_v4  ;;  %v129_v19 = vld [vmem:[#allocation7] sm:$0xff]  ;;  %v303_v20 = vld [vmem:[#allocation11 + $0x8] sm:$0xff]  ;;  %v302_v21 = vld [vmem:[#allocation11] sm:$0xff]  ;;  %s2794_s20 = scalar_lea.vmem %s2331_s19, 1024  ;;  %p2799_p8 = scmp.lt.s32.totalorder %s2331_s19, %s2331_s19 }
  0x5a   :  { %2457 = vmatprep.subr.mxu0 %v132_v5  ;;  %2469 = vmatpush3.msra.mxu1 %v218_v4  ;;  %v130_v22 = vld [vmem:[#allocation7 + $0x8] sm:$0xff]  ;;  %v3003_v38 = vld [vmem:[#allocation13] sm:$0xff]  ;;  %v3023_v51 = vld [vmem:[#allocation13 + $0x8] sm:$0xff]  ;;  %p2795_p7 = scmp.ne.s32.totalorder %s2331_s19, %s2794_s20  ;;  %p2800_p9 = scmp.lt.s32.totalorder %s2794_s20, %s2794_s20 }
  0x5b   :  { %2458 = vmatpush3.msra.mxu0 %v132_v5  ;;  %2470 = vmatprep.subr.mxu1 %v217_v6 }
  0x5c   :  { %2472 = vmatprep.mubr.msk.f32.mxu1 %vm135_vm0, %v127_v7  ;;  %2471 = vmatpush3.msra.mxu1 %v217_v6  ;;  %p2801_p10 = por %p2800_p9, %p2799_p8 }
  0x5d   :  { %2459 = vmatprep.subr.mxu0 %v131_v8  ;;  %2473 = vmatmul.mubr.msk.f32.vlgmr.msra.gmra.mxu1 %vm135_vm0, %v128_v9 }
  0x5e   :  { %2460 = vmatpush3.msra.mxu0 %v131_v8  ;;  %2461 = vmatprep.mubr.msk.f32.mxu0 %vm135_vm0, %v2950_v10  ;;  %p2802_p11 = pnand %p2801_p10, %p2795_p7 }
  0x5f   :  { %2462 = vmatmul.mubr.msk.f32.vlgmr.msra.gmra.mxu0 %vm135_vm0, %v2952_v11  ;;  %2486 = vmatprep.subr.mxu1 %v2855_v12 }
  0x60   :  { %2488 = vmatprep.mubr.msk.f32.mxu1 %vm2856_vm1, %v2855_v12  ;;  %2475 = vmatprep.subr.mxu0 %v305_v17 }
  0x61   :  { %2476 = vmatpush3.msra.mxu0 %v305_v17  ;;  %2483 = vmatprep.mubr.msk.f32.mxu0 %vm135_vm0, %v129_v19 }
  0x62   :  { %2477 = vmatprep.subr.mxu0 %v304_v18 }
  0x63   :  { %2478 = vmatpush3.msra.mxu0 %v304_v18 }
  0x64   :  { %2479 = vmatprep.subr.mxu0 %v303_v20 }
  0x65   :  { %2480 = vmatpush3.msra.mxu0 %v303_v20 }
  0x66   :  { %2481 = vmatprep.subr.mxu0 %v302_v21 }
  0x67   :  { %2482 = vmatpush3.msra.mxu0 %v302_v21 }
  0x68   :  { %2484 = vmatmul.mubr.msk.f32.vlgmr.msra.gmra.mxu0 %vm135_vm0, %v130_v22  ;;  %2496 = vmatprep.subr.mxu0 %v2855_v12 }
  0x69   :  { %2498 = vmatprep.mubr.msk.f32.mxu0 %vm2856_vm1, %v2855_v12  ;;  %2497 = vmatpush3.msra.mxu0 %v3003_v38 }
  0x6a   :  { %2506 = vmatprep.subr.mxu0 %v2855_v12 }
 0x11d   :  { %v2962_v13 = vpop.f32.mrf.mxu1 }
 0x11f   :  { %v2964_v14 = vpop.f32.mrf.mxu0  ;;  %v2966_v15 = vpop.f32.mrf.mxu1 }
 0x120   :  { %629 = vrot.lane.b32.xlu1 %v2966_v15, %s2857_s4  ;;  %2487 = vmatpush3.xpose.msk.msra.mxu1 %vm391_vm2, %v2966_v15 }
 0x121   :  { %2491 = vmatprep.subr.mxu1 %v2855_v12  ;;  %v2973_v16 = vpop.f32.mrf.mxu0 }
 0x123   :  { %2489 = vmatmul.mubr.msk.f32.vlgmr.msra.gmra.mxu1 %vm391_vm2, %v2973_v16 }
 0x124   :  { %627 = vrot.lane.b32.xlu1 %v2973_v16, %s2857_s4  ;;  %2493 = vmatprep.mubr.msk.f32.mxu1 %vm2856_vm1, %v2855_v12 }
 0x128   :  { %v2988_v31 = vpop.f32.mrf.mxu0 }
 0x12a   :  { %v2990_v32 = vpop.f32.mrf.mxu0 }
 0x12b   :  { %2492 = vmatpush3.msra.mxu1 %v2990_v32 }
 0x12c   :  { %2501 = vmatprep.subr.mxu1 %v2855_v12 }
 0x192   :  { %v630_v35 = vpop.permute.xlu1 %629 }
 0x196   :  { %v628_v37 = vpop.permute.xlu1 %627 }
 0x1e3   :  { %v464_v23 = vpop.f32.mrf.mxu1 }
 0x1e4   :  { %v468_v24 = vsel %vm391_vm2, %v464_v23, -inf }
 0x1e5   :  { %469 = vmax.xlane.f32.xlu0 %v468_v24  ;;  %v2490_v25 = vpop.f32.mrf.mxu1 }
 0x26e   :  { %v470_v26 = vpop.xlane.xlu0 %469 }
 0x26f   :  { %v471_v27 = vsub.f32 %v464_v23, %v470_v26 }
 0x271   :  { %v472_v28 = vmul.f32 1.442695, %v471_v27 }
 0x273   :  { %2622 = vpow2.f32 %v472_v28 }
 0x280   :  { %v2623_v29 = vpop.eup %2622 }
 0x281   :  { %v474_v30 = vsel %vm391_vm2, %v2623_v29, 0.0 }
 0x282   :  { %475 = vadd.xlane.f32.xlu0 %v474_v30 }
 0x30b   :  { %v476_v33 = vpop.xlane.xlu0 %475 }
 0x30c   :  { %2624 = vrcp.f32 %v476_v33  ;;  %v3066_v33 = vld [vmem:[#allocation13 + $0x18] sm:$0xff] }
 0x319   :  { %v2625_v34 = vpop.eup %2624 }
 0x31a   :  { %v478_v36 = vmul.f32 %v2625_v34, %v2623_v29 }
 0x31c   :  { %479 = vst.msk [vmem:[#allocation15] sm:$0xff] %vm391_vm2, %v478_v36  ;;  %2494 = vmatmul.mubr.msk.f32.vlgmr.msra.gmra.mxu1 %vm391_vm2, %v478_v36 }
 0x31d   :  { %2502 = vmatpush3.xpose.msk.msra.mxu1 %vm391_vm2, %v630_v35  ;;  %2503 = vmatprep.mubr.msk.f32.mxu1 %vm2856_vm1, %v2855_v12 }
 0x31e   :  { %2511 = vmatprep.subr.mxu1 %v2855_v12 }
 0x320   :  { %2504 = vmatmul.mubr.msk.f32.vlgmr.msra.gmra.mxu1 %vm391_vm2, %v628_v37 }
 0x321   :  { %2513 = vmatprep.mubr.msk.f32.mxu1 %vm2856_vm1, %v2855_v12  ;;  %2512 = vmatpush3.msra.mxu1 %v3023_v51 }
 0x322   :  { %2521 = vmatprep.subr.mxu1 %v2855_v12 }
 0x3dc   :  { %v549_v39 = vpop.f32.mrf.mxu1 }
 0x3dd   :  { %2499 = vmatmul.mubr.msk.f32.vlgmr.msra.gmra.mxu0 %vm391_vm2, %v549_v39 }
 0x3de   :  { %v2495_v40 = vpop.f32.mrf.mxu1  ;;  %2508 = vmatprep.mubr.msk.f32.mxu0 %vm2856_vm1, %v2855_v12 }
 0x3e0   :  { %v701_v41 = vpop.f32.mrf.mxu1 }
 0x3e1   :  { %v705_v42 = vsel %vm391_vm2, %v701_v41, -inf }
 0x3e2   :  { %706 = vmax.xlane.f32.xlu0 %v705_v42  ;;  %v2505_v43 = vpop.f32.mrf.mxu1 }
 0x3f8   :  { %719 = vrot.lane.b32.xlu0 %v2990_v32, %s2857_s4 }
 0x3fc   :  { %871 = vrot.lane.b32.xlu0 %v2966_v15, %s2858_s6 }
 0x400   :  { %869 = vrot.lane.b32.xlu0 %v2973_v16, %s2858_s6 }
 0x46b   :  { %v707_v44 = vpop.xlane.xlu0 %706 }
 0x46c   :  { %v708_v45 = vsub.f32 %v701_v41, %v707_v44 }
 0x46e   :  { %v709_v46 = vmul.f32 1.442695, %v708_v45 }
 0x46f   :  { %v720_v47 = vpop.permute.xlu0 %719 }
 0x470   :  { %2626 = vpow2.f32 %v709_v46  ;;  %2507 = vmatpush3.msra.mxu0 %v720_v47 }
 0x471   :  { %2516 = vmatprep.subr.mxu0 %v2855_v12 }
 0x473   :  { %v872_v55 = vpop.permute.xlu0 %871 }
 0x477   :  { %v870_v57 = vpop.permute.xlu0 %869 }
 0x47d   :  { %v2627_v48 = vpop.eup %2626 }
 0x47e   :  { %v711_v49 = vsel %vm391_vm2, %v2627_v48, 0.0 }
 0x47f   :  { %712 = vadd.xlane.f32.xlu1 %v711_v49 }
 0x490   :  { %960 = vrot.lane.b32.xlu1 %v2990_v32, %s2858_s6 }
 0x494   :  { %1112 = vrot.lane.b32.xlu1 %v2966_v15, %s2859_s17 }
 0x49d   :  { %v622_v50 = vpop.f32.mrf.mxu0 }
 0x49e   :  { %v626_v5 = vadd.f32 %v622_v50, %v2950_v10 }
 0x49f   :  { %v2500_v52 = vpop.f32.mrf.mxu0 }
 0x508   :  { %v713_v53 = vpop.xlane.xlu1 %712 }
 0x509   :  { %2628 = vrcp.f32 %v713_v53 }
 0x50c   :  { %v961_v59 = vpop.permute.xlu1 %960 }
 0x510   :  { %v1113_v9 = vpop.permute.xlu1 %1112 }
 0x516   :  { %v2629_v54 = vpop.eup %2628 }
 0x517   :  { %v715_v56 = vmul.f32 %v2629_v54, %v2627_v48 }
 0x519   :  { %717 = vst.msk [vmem:[#allocation15 + $0x8] sm:$0xff] %vm391_vm2, %v715_v56  ;;  %2509 = vmatmul.mubr.msk.f32.vlgmr.msra.gmra.mxu0 %vm391_vm2, %v715_v56 }
 0x51a   :  { %2517 = vmatpush3.xpose.msk.msra.mxu0 %vm391_vm2, %v872_v55  ;;  %2518 = vmatprep.mubr.msk.f32.mxu0 %vm2856_vm1, %v2855_v12 }
 0x51b   :  { %2526 = vmatprep.subr.mxu0 %v2855_v12 }
 0x51d   :  { %2519 = vmatmul.mubr.msk.f32.vlgmr.msra.gmra.mxu0 %vm391_vm2, %v870_v57 }
 0x51e   :  { %2528 = vmatprep.mubr.msk.f32.mxu0 %vm2856_vm1, %v2855_v12 }
 0x5d9   :  { %v791_v58 = vpop.f32.mrf.mxu0 }
 0x5da   :  { %2514 = vmatmul.mubr.msk.f32.vlgmr.msra.gmra.mxu1 %vm391_vm2, %v791_v58 }
 0x5db   :  { %2522 = vmatpush3.msra.mxu1 %v961_v59  ;;  %v2510_v60 = vpop.f32.mrf.mxu0  ;;  %2523 = vmatprep.mubr.msk.f32.mxu1 %vm2856_vm1, %v2855_v12 }
 0x5dc   :  { %2531 = vmatprep.subr.mxu1 %v2855_v12 }
 0x5dd   :  { %v943_v61 = vpop.f32.mrf.mxu0 }
 0x5de   :  { %v947_v62 = vsel %vm391_vm2, %v943_v61, -inf }
 0x5df   :  { %948 = vmax.xlane.f32.xlu0 %v947_v62  ;;  %v2520_v63 = vpop.f32.mrf.mxu0 }
 0x668   :  { %v949_v0 = vpop.xlane.xlu0 %948 }
 0x669   :  { %v950_v1 = vsub.f32 %v943_v61, %v949_v0 }
 0x66b   :  { %v951_v2 = vmul.f32 1.442695, %v950_v1 }
 0x66d   :  { %2630 = vpow2.f32 %v951_v2 }
 0x67a   :  { %v2631_v3 = vpop.eup %2630 }
 0x67b   :  { %v953_v4 = vsel %vm391_vm2, %v2631_v3, 0.0 }
 0x67c   :  { %954 = vadd.xlane.f32.xlu1 %v953_v4 }
 0x68d   :  { %1110 = vrot.lane.b32.xlu1 %v2973_v16, %s2859_s17  ;;  %v3054_v16 = vld [vmem:[#allocation13 + $0x10] sm:$0xff] }
 0x68e   :  { %2527 = vmatpush3.msra.mxu0 %v3054_v16 }
 0x68f   :  { %2536 = vmatprep.subr.mxu0 %v2855_v12 }
 0x69a   :  { %v864_v6 = vpop.f32.mrf.mxu1 }
 0x69b   :  { %v868_v7 = vadd.f32 %v864_v6, %v626_v5 }
 0x69c   :  { %v2515_v8 = vpop.f32.mrf.mxu1 }
 0x705   :  { %v955_v15 = vpop.xlane.xlu1 %954 }
 0x706   :  { %2632 = vrcp.f32 %v955_v15 }
 0x709   :  { %v1111_v10 = vpop.permute.xlu1 %1110 }
 0x713   :  { %v2633_v17 = vpop.eup %2632 }
 0x714   :  { %v957_v18 = vmul.f32 %v2633_v17, %v2631_v3 }
 0x716   :  { %959 = vst.msk [vmem:[#allocation15 + $0x10] sm:$0xff] %vm391_vm2, %v957_v18  ;;  %2524 = vmatmul.mubr.msk.f32.vlgmr.msra.gmra.mxu1 %vm391_vm2, %v957_v18 }
 0x717   :  { %2532 = vmatpush3.xpose.msk.msra.mxu1 %vm391_vm2, %v1113_v9  ;;  %2533 = vmatprep.mubr.msk.f32.mxu1 %vm2856_vm1, %v2855_v12 }
 0x718   :  { %2541 = vmatprep.subr.mxu1 %v2855_v12 }
 0x71a   :  { %2534 = vmatmul.mubr.msk.f32.vlgmr.msra.gmra.mxu1 %vm391_vm2, %v1111_v10 }
 0x71b   :  { %2543 = vmatprep.mubr.msk.f32.mxu1 %vm2856_vm1, %v2855_v12  ;;  %2542 = vmatpush3.msra.mxu1 %v3066_v33 }
 0x71c   :  { %2551 = vmatprep.subr.mxu1 %v2855_v12 }
 0x7d6   :  { %v1032_v19 = vpop.f32.mrf.mxu1 }
 0x7d7   :  { %2529 = vmatmul.mubr.msk.f32.vlgmr.msra.gmra.mxu0 %vm391_vm2, %v1032_v19 }
 0x7d8   :  { %v2525_v20 = vpop.f32.mrf.mxu1  ;;  %2538 = vmatprep.mubr.msk.f32.mxu0 %vm2856_vm1, %v2855_v12 }
 0x7da   :  { %v1184_v21 = vpop.f32.mrf.mxu1 }
 0x7db   :  { %v1188_v22 = vsel %vm391_vm2, %v1184_v21, -inf }
 0x7dc   :  { %1189 = vmax.xlane.f32.xlu0 %v1188_v22  ;;  %v2535_v23 = vpop.f32.mrf.mxu1 }
 0x7f2   :  { %1201 = vrot.lane.b32.xlu0 %v2990_v32, %s2859_s17 }
 0x865   :  { %v1190_v24 = vpop.xlane.xlu0 %1189 }
 0x866   :  { %v1191_v25 = vsub.f32 %v1184_v21, %v1190_v24 }
 0x868   :  { %v1192_v26 = vmul.f32 1.442695, %v1191_v25 }
 0x869   :  { %v1202_v27 = vpop.permute.xlu0 %1201 }
 0x86a   :  { %2634 = vpow2.f32 %v1192_v26  ;;  %2537 = vmatpush3.msra.mxu0 %v1202_v27 }
 0x86b   :  { %2546 = vmatprep.subr.mxu0 %v2855_v12 }
 0x877   :  { %v2635_v28 = vpop.eup %2634 }
 0x878   :  { %v1194_v29 = vsel %vm391_vm2, %v2635_v28, 0.0 }
 0x879   :  { %1195 = vadd.xlane.f32.xlu1 %v1194_v29 }
 0x897   :  { %v1105_v30 = vpop.f32.mrf.mxu0 }
 0x898   :  { %v1109_v34 = vadd.f32 %v1105_v30, %v868_v7 }
 0x899   :  { %v2530_v35 = vpop.f32.mrf.mxu0 }
 0x902   :  { %v1196_v32 = vpop.xlane.xlu1 %1195 }
 0x903   :  { %2636 = vrcp.f32 %v1196_v32 }
 0x910   :  { %v2637_v36 = vpop.eup %2636 }
 0x911   :  { %v1198_v37 = vmul.f32 %v2637_v36, %v2635_v28 }
 0x913   :  { %1200 = vst.msk [vmem:[#allocation15 + $0x18] sm:$0xff] %vm391_vm2, %v1198_v37  ;;  %2539 = vmatmul.mubr.msk.f32.vlgmr.msra.gmra.mxu0 %vm391_vm2, %v1198_v37 }
 0x914   :  { %2547 = vmatpush3.xpose.msk.msra.mxu0 %vm391_vm2, %v2962_v13  ;;  %2548 = vmatprep.mubr.msk.f32.mxu0 %vm2856_vm1, %v2855_v12 }
 0x915   :  { %2556 = vmatprep.subr.mxu0 %v2855_v12 }
 0x917   :  { %2549 = vmatmul.mubr.msk.f32.vlgmr.msra.gmra.mxu0 %vm391_vm2, %v2964_v14 }
 0x918   :  { %2557 = vmatpush3.msra.mxu0 %v3003_v38  ;;  %2558 = vmatprep.mubr.msk.f32.mxu0 %vm2856_vm1, %v2855_v12 }
 0x919   :  { %2566 = vmatprep.subr.mxu0 %v2855_v12 }
 0x9d3   :  { %v1273_v39 = vpop.f32.mrf.mxu0 }
 0x9d4   :  { %2544 = vmatmul.mubr.msk.f32.vlgmr.msra.gmra.mxu1 %vm391_vm2, %v1273_v39 }
 0x9d5   :  { %2552 = vmatpush3.msra.mxu1 %v2988_v31  ;;  %v2540_v40 = vpop.f32.mrf.mxu0  ;;  %2553 = vmatprep.mubr.msk.f32.mxu1 %vm2856_vm1, %v2855_v12 }
 0x9d6   :  { %2561 = vmatprep.subr.mxu1 %v2855_v12 }
 0x9d7   :  { %v1424_v41 = vpop.f32.mrf.mxu0 }
 0x9d8   :  { %v1428_v42 = vsel %vm391_vm2, %v1424_v41, -inf }
 0x9d9   :  { %1429 = vmax.xlane.f32.xlu0 %v1428_v42  ;;  %v2550_v38 = vpop.f32.mrf.mxu0 }
 0x9ef   :  { %1588 = vrot.lane.b32.xlu0 %v2964_v14, %s2857_s4 }
 0xa62   :  { %v1430_v43 = vpop.xlane.xlu0 %1429 }
 0xa63   :  { %v1431_v44 = vsub.f32 %v1424_v41, %v1430_v43 }
 0xa65   :  { %v1432_v45 = vmul.f32 1.442695, %v1431_v44 }
 0xa66   :  { %v1589_v56 = vpop.permute.xlu0 %1588 }
 0xa67   :  { %2638 = vpow2.f32 %v1432_v45 }
 0xa74   :  { %v2639_v46 = vpop.eup %2638 }
 0xa75   :  { %v1434_v47 = vsel %vm391_vm2, %v2639_v46, 0.0 }
 0xa76   :  { %1435 = vadd.xlane.f32.xlu1 %v1434_v47 }
 0xa87   :  { %1590 = vrot.lane.b32.xlu1 %v2962_v13, %s2857_s4 }
 0xa94   :  { %v1346_v48 = vpop.f32.mrf.mxu1 }
 0xa95   :  { %v1350_v49 = vadd.f32 %v1346_v48, %v1109_v34 }
 0xa96   :  { %v2545_v50 = vpop.f32.mrf.mxu1 }
 0xa97   :  { %1351 = vst.msk [vmem:[#allocation14] sm:$0xff] %vm135_vm0, %v1350_v49 }
 0xaff   :  { %v1436_v52 = vpop.xlane.xlu1 %1435 }
 0xb00   :  { %2640 = vrcp.f32 %v1436_v52 }
 0xb03   :  { %v1591_v55 = vpop.permute.xlu1 %1590 }
 0xb0d   :  { %v2641_v53 = vpop.eup %2640 }
 0xb0e   :  { %v1438_v54 = vmul.f32 %v2641_v53, %v2639_v46 }
 0xb10   :  { %1440 = vst.msk [vmem:[#allocation15 + $0x20] sm:$0xff] %vm391_vm2, %v1438_v54  ;;  %2554 = vmatmul.mubr.msk.f32.vlgmr.msra.gmra.mxu1 %vm391_vm2, %v1438_v54 }
 0xb11   :  { %2562 = vmatpush3.xpose.msk.msra.mxu1 %vm391_vm2, %v1591_v55  ;;  %2563 = vmatprep.mubr.msk.f32.mxu1 %vm2856_vm1, %v2855_v12 }
 0xb12   :  { %2571 = vmatprep.subr.mxu1 %v2855_v12 }
 0xb14   :  { %2564 = vmatmul.mubr.msk.f32.vlgmr.msra.gmra.mxu1 %vm391_vm2, %v1589_v56 }
 0xb15   :  { %2572 = vmatpush3.msra.mxu1 %v3023_v51  ;;  %2573 = vmatprep.mubr.msk.f32.mxu1 %vm2856_vm1, %v2855_v12 }
 0xb16   :  { %2581 = vmatprep.subr.mxu1 %v2855_v12 }
 0xbd0   :  { %v1510_v57 = vpop.f32.mrf.mxu1 }
 0xbd1   :  { %2559 = vmatmul.mubr.msk.f32.vlgmr.msra.gmra.mxu0 %vm391_vm2, %v1510_v57 }
 0xbd2   :  { %v2555_v58 = vpop.f32.mrf.mxu1  ;;  %2568 = vmatprep.mubr.msk.f32.mxu0 %vm2856_vm1, %v2855_v12 }
 0xbd4   :  { %v1662_v59 = vpop.f32.mrf.mxu1 }
 0xbd5   :  { %v1666_v60 = vsel %vm391_vm2, %v1662_v59, -inf }
 0xbd6   :  { %1667 = vmax.xlane.f32.xlu1 %v1666_v60  ;;  %v2565_v61 = vpop.f32.mrf.mxu1 }
 0xbe7   :  { %1680 = vrot.lane.b32.xlu1 %v2988_v31, %s2857_s4 }
 0xbeb   :  { %1830 = vrot.lane.b32.xlu1 %v2964_v14, %s2858_s6 }
 0xc5f   :  { %v1668_v51 = vpop.xlane.xlu1 %1667 }
 0xc60   :  { %v1669_v62 = vsub.f32 %v1662_v59, %v1668_v51 }
 0xc62   :  { %v1670_v63 = vmul.f32 1.442695, %v1669_v62 }
 0xc63   :  { %v1681_v0 = vpop.permute.xlu1 %1680 }
 0xc64   :  { %2642 = vpow2.f32 %v1670_v63  ;;  %2567 = vmatpush3.msra.mxu0 %v1681_v0 }
 0xc65   :  { %2576 = vmatprep.subr.mxu0 %v2855_v12 }
 0xc67   :  { %v1831_v9 = vpop.permute.xlu1 %1830 }
 0xc71   :  { %v2643_v1 = vpop.eup %2642 }
 0xc72   :  { %v1672_v2 = vsel %vm391_vm2, %v2643_v1, 0.0 }
 0xc73   :  { %1673 = vadd.xlane.f32.xlu0 %v1672_v2 }
 0xc89   :  { %1832 = vrot.lane.b32.xlu0 %v2962_v13, %s2858_s6 }
 0xc91   :  { %v1583_v3 = vpop.f32.mrf.mxu0 }
 0xc92   :  { %v1587_v25 = vadd.f32 %v1583_v3, %v2952_v11 }
 0xc93   :  { %v2560_v4 = vpop.f32.mrf.mxu0 }
 0xcfc   :  { %v1674_v5 = vpop.xlane.xlu0 %1673 }
 0xcfd   :  { %2644 = vrcp.f32 %v1674_v5 }
 0xd00   :  { %v1833_v8 = vpop.permute.xlu0 %1832 }
 0xd0a   :  { %v2645_v6 = vpop.eup %2644 }
 0xd0b   :  { %v1676_v7 = vmul.f32 %v2645_v6, %v2643_v1 }
 0xd0d   :  { %1678 = vst.msk [vmem:[#allocation15 + $0x28] sm:$0xff] %vm391_vm2, %v1676_v7  ;;  %2569 = vmatmul.mubr.msk.f32.vlgmr.msra.gmra.mxu0 %vm391_vm2, %v1676_v7 }
 0xd0e   :  { %2577 = vmatpush3.xpose.msk.msra.mxu0 %vm391_vm2, %v1833_v8  ;;  %2578 = vmatprep.mubr.msk.f32.mxu0 %vm2856_vm1, %v2855_v12 }
 0xd0f   :  { %2586 = vmatprep.subr.mxu0 %v2855_v12 }
 0xd11   :  { %2579 = vmatmul.mubr.msk.f32.vlgmr.msra.gmra.mxu0 %vm391_vm2, %v1831_v9 }
 0xd12   :  { %2587 = vmatpush3.msra.mxu0 %v3054_v16  ;;  %2588 = vmatprep.mubr.msk.f32.mxu0 %vm2856_vm1, %v2855_v12 }
 0xd13   :  { %2596 = vmatprep.subr.mxu0 %v2855_v12 }
 0xdcd   :  { %v1752_v15 = vpop.f32.mrf.mxu0 }
 0xdce   :  { %2574 = vmatmul.mubr.msk.f32.vlgmr.msra.gmra.mxu1 %vm391_vm2, %v1752_v15 }
 0xdcf   :  { %v2570_v17 = vpop.f32.mrf.mxu0  ;;  %2583 = vmatprep.mubr.msk.f32.mxu1 %vm2856_vm1, %v2855_v12 }
 0xdd1   :  { %v1904_v18 = vpop.f32.mrf.mxu0 }
 0xdd2   :  { %v1908_v10 = vsel %vm391_vm2, %v1904_v18, -inf }
 0xdd3   :  { %1909 = vmax.xlane.f32.xlu1 %v1908_v10  ;;  %v2580_v19 = vpop.f32.mrf.mxu0 }
 0xde4   :  { %1921 = vrot.lane.b32.xlu1 %v2988_v31, %s2858_s6 }
 0xde8   :  { %2071 = vrot.lane.b32.xlu1 %v2964_v14, %s2859_s17 }
 0xe5c   :  { %v1910_v16 = vpop.xlane.xlu1 %1909 }
 0xe5d   :  { %v1911_v20 = vsub.f32 %v1904_v18, %v1910_v16 }
 0xe5f   :  { %v1912_v21 = vmul.f32 1.442695, %v1911_v20 }
 0xe60   :  { %v1922_v22 = vpop.permute.xlu1 %1921 }
 0xe61   :  { %2646 = vpow2.f32 %v1912_v21  ;;  %2582 = vmatpush3.msra.mxu1 %v1922_v22 }
 0xe62   :  { %2591 = vmatprep.subr.mxu1 %v2855_v12 }
 0xe64   :  { %v2072_v11 = vpop.permute.xlu1 %2071 }
 0xe6e   :  { %v2647_v23 = vpop.eup %2646 }
 0xe6f   :  { %v1914_v24 = vsel %vm391_vm2, %v2647_v23, 0.0 }
 0xe70   :  { %1915 = vadd.xlane.f32.xlu0 %v1914_v24 }
 0xe86   :  { %2073 = vrot.lane.b32.xlu0 %v2962_v13, %s2859_s17 }
 0xe8e   :  { %v1825_v26 = vpop.f32.mrf.mxu1 }
 0xe8f   :  { %v1829_v27 = vadd.f32 %v1825_v26, %v1587_v25 }
 0xe90   :  { %v2575_v14 = vpop.f32.mrf.mxu1 }
 0xef9   :  { %v1916_v28 = vpop.xlane.xlu0 %1915 }
 0xefa   :  { %2648 = vrcp.f32 %v1916_v28 }
 0xefd   :  { %v2074_v34 = vpop.permute.xlu0 %2073 }
 0xf07   :  { %v2649_v29 = vpop.eup %2648 }
 0xf08   :  { %v1918_v30 = vmul.f32 %v2649_v29, %v2647_v23 }
 0xf0a   :  { %1920 = vst.msk [vmem:[#allocation15 + $0x30] sm:$0xff] %vm391_vm2, %v1918_v30  ;;  %2584 = vmatmul.mubr.msk.f32.vlgmr.msra.gmra.mxu1 %vm391_vm2, %v1918_v30 }
 0xf0b   :  { %2592 = vmatpush3.xpose.msk.msra.mxu1 %vm391_vm2, %v2074_v34  ;;  %2593 = vmatprep.mubr.msk.f32.mxu1 %vm2856_vm1, %v2855_v12 }
 0xf0c   :  { %2601 = vmatprep.subr.mxu1 %v2855_v12 }
 0xf0e   :  { %2594 = vmatmul.mubr.msk.f32.vlgmr.msra.gmra.mxu1 %vm391_vm2, %v2072_v11 }
 0xf0f   :  { %2602 = vmatpush3.msra.mxu1 %v3066_v33  ;;  %2603 = vmatprep.mubr.msk.f32.mxu1 %vm2856_vm1, %v2855_v12 }
 0xfca   :  { %v1993_v13 = vpop.f32.mrf.mxu1 }
 0xfcb   :  { %2589 = vmatmul.mubr.msk.f32.vlgmr.msra.gmra.mxu0 %vm391_vm2, %v1993_v13 }
 0xfcc   :  { %v2585_v35 = vpop.f32.mrf.mxu1  ;;  %2598 = vmatprep.mubr.msk.f32.mxu0 %vm2856_vm1, %v2855_v12 }
 0xfce   :  { %v2145_v32 = vpop.f32.mrf.mxu1 }
 0xfcf   :  { %v2149_v36 = vsel %vm391_vm2, %v2145_v32, -inf }
 0xfd0   :  { %2150 = vmax.xlane.f32.xlu1 %v2149_v36  ;;  %v2595_v37 = vpop.f32.mrf.mxu1 }
 0xfe1   :  { %2162 = vrot.lane.b32.xlu1 %v2988_v31, %s2859_s17 }
0x1059   :  { %v2151_v39 = vpop.xlane.xlu1 %2150 }
0x105a   :  { %v2152_v33 = vsub.f32 %v2145_v32, %v2151_v39 }
0x105c   :  { %v2153_v40 = vmul.f32 1.442695, %v2152_v33 }
0x105d   :  { %v2163_v41 = vpop.permute.xlu1 %2162 }
0x105e   :  { %2650 = vpow2.f32 %v2153_v40  ;;  %2597 = vmatpush3.msra.mxu0 %v2163_v41 }
0x106b   :  { %v2651_v42 = vpop.eup %2650 }
0x106c   :  { %v2155_v38 = vsel %vm391_vm2, %v2651_v42, 0.0 }
0x106d   :  { %2156 = vadd.xlane.f32.xlu0 %v2155_v38 }
0x108b   :  { %v2066_v43 = vpop.f32.mrf.mxu0 }
0x108c   :  { %v2070_v12 = vadd.f32 %v2066_v43, %v1829_v27 }
0x108d   :  { %v2590_v44 = vpop.f32.mrf.mxu0 }
0x10f6   :  { %v2157_v45 = vpop.xlane.xlu0 %2156 }
0x10f7   :  { %2652 = vrcp.f32 %v2157_v45 }
0x1104   :  { %v2653_v46 = vpop.eup %2652 }
0x1105   :  { %v2159_v47 = vmul.f32 %v2653_v46, %v2651_v42 }
0x1107   :  { %2161 = vst.msk [vmem:[#allocation15 + $0x38] sm:$0xff] %vm391_vm2, %v2159_v47  ;;  %2599 = vmatmul.mubr.msk.f32.vlgmr.msra.gmra.mxu0 %vm391_vm2, %v2159_v47 }
0x11c7   :  { %v2234_v31 = vpop.f32.mrf.mxu0 }
0x11c8   :  { %2604 = vmatmul.mubr.msk.f32.vlgmr.msra.gmra.mxu1 %vm391_vm2, %v2234_v31 }
0x11c9   :  { %v2600_v48 = vpop.f32.mrf.mxu0 }
0x11ca   :  { %2805 = shalt.err (!%p2802_p11)
}
0x11cb   :  { %2336 = dma.vmem_to_hbm [thread:$0]  %s2331_s19, 1024, %s3183_s8, [#allocation16], %s2848_s10, %s2848_s10, %s2849_s11  }
0x11cc   :  { %s2861_s22 = smov [#allocation14]  }
0x11cd   :  { %s2318_s3 = sshll.u32 %s2861_s22, 4  ;;  %s2319_s3 = int_to_ptr.vmem [resolvable:$true] %s2318_s3 }
0x11ce   :  { %s2814_s23 = scalar_lea.vmem %s2319_s3, 256  ;;  %p2819_p13 = scmp.lt.s32.totalorder %s2319_s3, %s2319_s3 }
0x11cf   :  { %p2815_p12 = scmp.ne.s32.totalorder %s2319_s3, %s2814_s23  ;;  %p2820_p0 = scmp.lt.s32.totalorder %s2814_s23, %s2814_s23 }
0x11d1   :  { %p2821_p1 = por %p2820_p0, %p2819_p13 }
0x11d3   :  { %p2822_p2 = pnand %p2821_p1, %p2815_p12 }
0x1288   :  { %v2307_v49 = vpop.f32.mrf.mxu1 }
0x1289   :  { %v2311_v50 = vadd.f32 %v2307_v49, %v2070_v12 }
0x128a   :  { %v2605_v52 = vpop.f32.mrf.mxu1 }
0x128b   :  { %2312 = vst.msk [vmem:[#allocation14 + $0x8] sm:$0xff] %vm135_vm0, %v2311_v50 }
0x128c   :  { %2825 = shalt.err (!%p2822_p2)
}
0x128d   :  { %2324 = dma.vmem_to_hbm [thread:$0]  %s2319_s3, 256, %s3182_s7, [#allocation4], %s2848_s10, %s2848_s10, %s2849_s11  }
0x128e   :  { %2842 = dma.done.wait [#allocation4], 256  }
0x128f   :  { %2843 = vsyncadd [#allocation4], 4294967040 }
0x1290   :  { %2844 = dma.done.wait [#allocation16], 1024  }
0x1291   :  { %2845 = vsyncadd [#allocation16], 4294966272 }
0x1292   :  { %2343 = vsyncpa [#allocation3], 1 }
0x1293   :  { %2344 = vsyncpa [#allocation6], 1 }
0x1294   :  { %2345 = vsyncpa [#allocation9], 1 }
0x1295   :  { %2346 = vsyncpa [#allocation12], 1 }
0x1296   :  { %2347 = vsyncpa [#allocation4], 1 }
0x1297   :  { %2348 = vsyncpa [#allocation16], 1 }

</bundles_post_ra>
